<compile_context>
chip_gen: v7x
topology: tpu7x:2x2x1
jax: 0.10.0
libtpu: 0.0.40
codegen_flags: <defaults>
</compile_context>

<pallas_src>
import jax
import jax.numpy as jnp
from jax.experimental import pallas as pl
from jax.experimental.pallas import tpu as pltpu

HIDDEN = 64               # DEFAULT_HIDDEN_UNITS
FUSED = 2 * HIDDEN        # 128 lanes for the fused hidden layers
MAX_TILE_B = 2048         # large batch tile: per-grid-step overhead dominates
SPLIT_THRESHOLD_B = 256   # above this, force >=2 grid steps (v7x dual-TC use)


def lower_network_kernel(x_ref, w1_ref, b1_ref, w2_ref, b2_ref, w3_ref, b3_ref,
                         out_ref):
    """Fused policy+termination MLP. out[:, :A] = tanh head, out[:, A] = sigmoid."""
    x = x_ref[...]  # bf16

    # bf16 operands on the MXU, f32 accumulation; activations kept bf16
    # (bf16 EUP tanh path on v6e/v7x; correct-but-not-faster on v5e).
    h = jnp.tanh(
        (jnp.dot(x, w1_ref[...], preferred_element_type=jnp.float32)
         + b1_ref[...]).astype(jnp.bfloat16))
    h = jnp.tanh(
        (jnp.dot(h, w2_ref[...], preferred_element_type=jnp.float32)
         + b2_ref[...]).astype(jnp.bfloat16))
    z = jnp.dot(h, w3_ref[...], preferred_element_type=jnp.float32) + b3_ref[...]

    # Columns 0..A-1 -> tanh (mean_action), column A -> sigmoid (termination).
    # sigmoid(z) = 0.5*(tanh(0.5*z)+1): one tanh pass, no fp divide.
    a = z.shape[-1] - 1                                     # static action_dim
    lane = jax.lax.broadcasted_iota(jnp.int32, z.shape, dimension=1)
    is_mean = lane < a
    t = jnp.tanh(jnp.where(is_mean, z, 0.5 * z))
    out = jnp.where(is_mean, t, 0.5 * (t + 1.0))
    out_ref[...] = out.astype(out_ref.dtype)


def pack_params(p, hidden=HIDDEN, weight_dtype=jnp.bfloat16):
    """Pack the two heads into one block-diagonal 128-lane MLP.

    Call ONCE at init / parameter-update time (not per forward step): the
    block-diagonal construction allocates and copies (128,128)/(128,A+1)
    arrays and would otherwise sit in the rollout hot path.
    """
    action_dim = p["pw3"].shape[1]
    f32 = jnp.float32

    w1 = jnp.concatenate([p["pw1"], p["tw1"]], axis=1).astype(weight_dtype)
    b1 = jnp.concatenate([p["pb1"], p["tb1"]], axis=1).astype(f32)

    w2 = jnp.zeros((2 * hidden, 2 * hidden), f32)
    w2 = w2.at[:hidden, :hidden].set(p["pw2"])
    w2 = w2.at[hidden:, hidden:].set(p["tw2"])
    w2 = w2.astype(weight_dtype)
    b2 = jnp.concatenate([p["pb2"], p["tb2"]], axis=1).astype(f32)

    w3 = jnp.zeros((2 * hidden, action_dim + 1), f32)
    w3 = w3.at[:hidden, :action_dim].set(p["pw3"])
    w3 = w3.at[hidden:, action_dim:].set(p["tw3"])
    w3 = w3.astype(weight_dtype)
    b3 = jnp.concatenate([p["pb3"], p["tb3"]], axis=1).astype(f32)

    return dict(w1=w1, b1=b1, w2=w2, b2=b2, w3=w3, b3=b3,
                std=p["std"].astype(f32))


def _choose_tile_b(B):
    """Batch tile: full array for small B; else >=2 grid steps, 16-aligned."""
    if B <= SPLIT_THRESHOLD_B:
        return B                       # single full-extent block (8,128)-legal
    half = -(-B // 2)                  # ceil(B/2): guarantees >=2 grid steps
    half = ((half + 15) // 16) * 16    # keep the tile a multiple of 16
    return min(MAX_TILE_B, half)


def lower_network_forward(x, packed):
    """x: (B, obs_dim) f32. packed: output of pack_params()."""
    B, obs_dim = x.shape
    w1, b1 = packed["w1"], packed["b1"]
    w2, b2 = packed["w2"], packed["b2"]
    w3, b3 = packed["w3"], packed["b3"]
    action_dim = w3.shape[1] - 1
    out_w = action_dim + 1

    x_in = x.astype(w1.dtype)          # bf16 input: halves the dominant x DMA

    tile_b = _choose_tile_b(B)
    grid = (pl.cdiv(B, tile_b),)

    fused = pl.pallas_call(
        lower_network_kernel,
        out_shape=jax.ShapeDtypeStruct((B, out_w), jnp.float32),
        grid=grid,
        in_specs=[
            pl.BlockSpec((tile_b, obs_dim), lambda i: (i, 0)),   # x: batch-tiled
            pl.BlockSpec(w1.shape, lambda i: (0, 0)),            # weights stay
            pl.BlockSpec(b1.shape, lambda i: (0, 0)),            # VMEM-resident
            pl.BlockSpec(w2.shape, lambda i: (0, 0)),
            pl.BlockSpec(b2.shape, lambda i: (0, 0)),
            pl.BlockSpec(w3.shape, lambda i: (0, 0)),
            pl.BlockSpec(b3.shape, lambda i: (0, 0)),
        ],
        out_specs=pl.BlockSpec((tile_b, out_w), lambda i: (i, 0)),
        compiler_params=pltpu.CompilerParams(
            dimension_semantics=("parallel",),
            vmem_limit_bytes=32 * 1024 * 1024),
    )(x_in, w1, b1, w2, b2, w3, b3)

    mean_action = fused[:, :action_dim]
    termination_prob = fused[:, action_dim:]
    # softplus(std) is x-independent: computed in plain JAX, broadcast only.
    std_action = jnp.broadcast_to(jax.nn.softplus(packed["std"]),
                                  (B, action_dim))

    return {
        "mean_action": mean_action,
        "std_action": std_action,
        "termination_prob": termination_prob,
    }


def init_params(key, obs_dim, action_dim, hidden=HIDDEN):
    """Deterministic synthetic init (PyTorch-Linear-like uniform fan-in)."""
    ks = jax.random.split(key, 12)

    def lin(kw, kb, din, dout):
        bound = 1.0 / jnp.sqrt(float(din))
        w = jax.random.uniform(kw, (din, dout), jnp.float32, -bound, bound)
        b = jax.random.uniform(kb, (1, dout), jnp.float32, -bound, bound)
        return w, b

    pw1, pb1 = lin(ks[0], ks[1], obs_dim, hidden)
    pw2, pb2 = lin(ks[2], ks[3], hidden, hidden)
    pw3, pb3 = lin(ks[4], ks[5], hidden, action_dim)
    tw1, tb1 = lin(ks[6], ks[7], obs_dim, hidden)
    tw2, tb2 = lin(ks[8], ks[9], hidden, hidden)
    tw3, tb3 = lin(ks[10], ks[11], hidden, 1)
    std = jnp.zeros((1, action_dim), jnp.float32)  # nn.Parameter(torch.zeros)

    return dict(pw1=pw1, pb1=pb1, pw2=pw2, pb2=pb2, pw3=pw3, pb3=pb3,
                tw1=tw1, tb1=tb1, tw2=tw2, tb2=tb2, tw3=tw3, tb3=tb3, std=std)


def reference_forward(x, p):
    """Pure-JAX f32 reference matching the PyTorch module."""
    h = jnp.tanh(x @ p["pw1"] + p["pb1"])
    h = jnp.tanh(h @ p["pw2"] + p["pb2"])
    mean = jnp.tanh(h @ p["pw3"] + p["pb3"])
    g = jnp.tanh(x @ p["tw1"] + p["tb1"])
    g = jnp.tanh(g @ p["tw2"] + p["tb2"])
    term = jax.nn.sigmoid(g @ p["tw3"] + p["tb3"])
    std = jnp.broadcast_to(jax.nn.softplus(p["std"]), mean.shape)
    return {"mean_action": mean, "std_action": std, "termination_prob": term}


if __name__ == "__main__":
    OBS_DIM, ACTION_DIM = 32, 4

    key = jax.random.PRNGKey(0)
    kx_small, kx_big, kp = jax.random.split(key, 3)
    params = init_params(kp, OBS_DIM, ACTION_DIM)
    packed = pack_params(params)               # pack ONCE, outside the hot path

    fwd = jax.jit(lower_network_forward)

    # Small-batch check (single grid step) and a larger one that exercises the
    # multi-step / ragged-tail batch tiling path.
    for B, kx in ((8, kx_small), (300, kx_big)):
        x = jax.random.normal(kx, (B, OBS_DIM), jnp.float32)
        out = jax.block_until_ready(fwd(x, packed))
        ref = reference_forward(x, params)
        for k in out:
            assert out[k].shape == ref[k].shape, (B, k, out[k].shape, ref[k].shape)
            # bf16 weights/activations in the kernel vs f32 reference.
            assert jnp.allclose(out[k], ref[k], atol=2e-2, rtol=2e-2), (B, k)

    print("KERNEL_OK")
</pallas_src>

<mosaic_0001>
module attributes {stable_mosaic.version = 11 : i64} {
  func.func @lower_network_kernel(%arg0: i32, %arg1: memref<8x32xbf16, #tpu.memory_space<vmem>>, %arg2: memref<32x128xbf16, #tpu.memory_space<vmem>>, %arg3: memref<1x128xf32, #tpu.memory_space<vmem>>, %arg4: memref<128x128xbf16, #tpu.memory_space<vmem>>, %arg5: memref<1x128xf32, #tpu.memory_space<vmem>>, %arg6: memref<128x5xbf16, #tpu.memory_space<vmem>>, %arg7: memref<1x5xf32, #tpu.memory_space<vmem>>, %arg8: memref<8x5xf32, #tpu.memory_space<vmem>>) attributes {dimension_semantics = [#tpu.dimension_semantics<parallel>], iteration_bounds = array<i64: 1>, scalar_prefetch = 0 : i64, scratch_operands = 0 : i64, tpu.core_type = #tpu.core_type<tc>, window_params = [{transform_indices = @transform_0, window_bounds = array<i64: 8, 32>}, {pipeline_mode = #tpu.pipeline_mode<synchronous>, transform_indices = @transform_1, window_bounds = array<i64: 32, 128>}, {pipeline_mode = #tpu.pipeline_mode<synchronous>, transform_indices = @transform_2, window_bounds = array<i64: 1, 128>}, {pipeline_mode = #tpu.pipeline_mode<synchronous>, transform_indices = @transform_3, window_bounds = array<i64: 128, 128>}, {pipeline_mode = #tpu.pipeline_mode<synchronous>, transform_indices = @transform_4, window_bounds = array<i64: 1, 128>}, {pipeline_mode = #tpu.pipeline_mode<synchronous>, transform_indices = @transform_5, window_bounds = array<i64: 128, 5>}, {pipeline_mode = #tpu.pipeline_mode<synchronous>, transform_indices = @transform_6, window_bounds = array<i64: 1, 5>}, {transform_indices = @transform_7, window_bounds = array<i64: 8, 5>}]} {
    %c0 = arith.constant 0 : index
    %c0_0 = arith.constant 0 : index
    %0 = vector.load %arg1[%c0, %c0_0] : memref<8x32xbf16, #tpu.memory_space<vmem>>, vector<8x32xbf16>
    %c0_1 = arith.constant 0 : index
    %c0_2 = arith.constant 0 : index
    %1 = vector.load %arg2[%c0_1, %c0_2] : memref<32x128xbf16, #tpu.memory_space<vmem>>, vector<32x128xbf16>
    %cst = arith.constant dense<0.000000e+00> : vector<8x128xf32>
    %2 = tpu.matmul %0, %1, %cst {dimension_numbers = #tpu.dot_dimension_numbers<[1], [0], [0], [1], [0, 0, 1, 1], [], []>} : vector<8x32xbf16>, vector<32x128xbf16>, vector<8x128xf32> -> vector<8x128xf32>
    %c0_3 = arith.constant 0 : index
    %c0_4 = arith.constant 0 : index
    %3 = vector.load %arg3[%c0_3, %c0_4] : memref<1x128xf32, #tpu.memory_space<vmem>>, vector<1x128xf32>
    %4 = vector.broadcast %3 : vector<1x128xf32> to vector<8x128xf32>
    %5 = arith.addf %2, %4 : vector<8x128xf32>
    %6 = arith.truncf %5 : vector<8x128xf32> to vector<8x128xbf16>
    %7 = math.tanh %6 : vector<8x128xbf16>
    %c0_5 = arith.constant 0 : index
    %c0_6 = arith.constant 0 : index
    %8 = vector.load %arg4[%c0_5, %c0_6] : memref<128x128xbf16, #tpu.memory_space<vmem>>, vector<128x128xbf16>
    %cst_7 = arith.constant dense<0.000000e+00> : vector<8x128xf32>
    %9 = tpu.matmul %7, %8, %cst_7 {dimension_numbers = #tpu.dot_dimension_numbers<[1], [0], [0], [1], [0, 0, 1, 1], [], []>} : vector<8x128xbf16>, vector<128x128xbf16>, vector<8x128xf32> -> vector<8x128xf32>
    %c0_8 = arith.constant 0 : index
    %c0_9 = arith.constant 0 : index
    %10 = vector.load %arg5[%c0_8, %c0_9] : memref<1x128xf32, #tpu.memory_space<vmem>>, vector<1x128xf32>
    %11 = vector.broadcast %10 : vector<1x128xf32> to vector<8x128xf32>
    %12 = arith.addf %9, %11 : vector<8x128xf32>
    %13 = arith.truncf %12 : vector<8x128xf32> to vector<8x128xbf16>
    %14 = math.tanh %13 : vector<8x128xbf16>
    %c0_10 = arith.constant 0 : index
    %c0_11 = arith.constant 0 : index
    %15 = vector.load %arg6[%c0_10, %c0_11] : memref<128x5xbf16, #tpu.memory_space<vmem>>, vector<128x5xbf16>
    %cst_12 = arith.constant dense<0.000000e+00> : vector<8x5xf32>
    %16 = tpu.matmul %14, %15, %cst_12 {dimension_numbers = #tpu.dot_dimension_numbers<[1], [0], [0], [1], [0, 0, 1, 1], [], []>} : vector<8x128xbf16>, vector<128x5xbf16>, vector<8x5xf32> -> vector<8x5xf32>
    %c0_13 = arith.constant 0 : index
    %c0_14 = arith.constant 0 : index
    %17 = vector.load %arg7[%c0_13, %c0_14] : memref<1x5xf32, #tpu.memory_space<vmem>>, vector<1x5xf32>
    %18 = vector.broadcast %17 : vector<1x5xf32> to vector<8x5xf32>
    %19 = arith.addf %16, %18 : vector<8x5xf32>
    %20 = tpu.iota {dimensions = array<i32: 1>} : vector<8x5xi32>
    %c4_i32 = arith.constant 4 : i32
    %21 = vector.broadcast %c4_i32 : i32 to vector<8x5xi32>
    %22 = arith.cmpi slt, %20, %21 : vector<8x5xi32>
    %cst_15 = arith.constant 5.000000e-01 : f32
    %23 = vector.broadcast %cst_15 : f32 to vector<8x5xf32>
    %24 = arith.mulf %23, %19 : vector<8x5xf32>
    %25 = arith.select %22, %19, %24 : vector<8x5xi1>, vector<8x5xf32>
    %26 = math.tanh %25 : vector<8x5xf32>
    %cst_16 = arith.constant 1.000000e+00 : f32
    %27 = vector.broadcast %cst_16 : f32 to vector<8x5xf32>
    %28 = arith.addf %26, %27 : vector<8x5xf32>
    %cst_17 = arith.constant 5.000000e-01 : f32
    %29 = vector.broadcast %cst_17 : f32 to vector<8x5xf32>
    %30 = arith.mulf %29, %28 : vector<8x5xf32>
    %31 = arith.select %22, %26, %30 : vector<8x5xi1>, vector<8x5xf32>
    %c0_18 = arith.constant 0 : index
    %c0_19 = arith.constant 0 : index
    %32 = vector.load %arg8[%c0_18, %c0_19] : memref<8x5xf32, #tpu.memory_space<vmem>>, vector<8x5xf32>
    tpu.vector_store %arg8[%c0_18, %c0_19], %31 {strides = array<i32>} : memref<8x5xf32, #tpu.memory_space<vmem>>, vector<8x5xf32>,
    return
  }
  func.func @transform_0(%arg0: i32) -> (i32, i32) {
    %c0_i32 = arith.constant 0 : i32
    %c0_i32_0 = arith.constant 0 : i32
    return %arg0, %c0_i32 : i32, i32
  }
  func.func @transform_1(%arg0: i32) -> (i32, i32) {
    %c0_i32 = arith.constant 0 : i32
    %c0_i32_0 = arith.constant 0 : i32
    %c0_i32_1 = arith.constant 0 : i32
    return %c0_i32, %c0_i32_0 : i32, i32
  }
  func.func @transform_2(%arg0: i32) -> (i32, i32) {
    %c0_i32 = arith.constant 0 : i32
    %c0_i32_0 = arith.constant 0 : i32
    %c0_i32_1 = arith.constant 0 : i32
    return %c0_i32, %c0_i32_0 : i32, i32
  }
  func.func @transform_3(%arg0: i32) -> (i32, i32) {
    %c0_i32 = arith.constant 0 : i32
    %c0_i32_0 = arith.constant 0 : i32
    %c0_i32_1 = arith.constant 0 : i32
    return %c0_i32, %c0_i32_0 : i32, i32
  }
  func.func @transform_4(%arg0: i32) -> (i32, i32) {
    %c0_i32 = arith.constant 0 : i32
    %c0_i32_0 = arith.constant 0 : i32
    %c0_i32_1 = arith.constant 0 : i32
    return %c0_i32, %c0_i32_0 : i32, i32
  }
  func.func @transform_5(%arg0: i32) -> (i32, i32) {
    %c0_i32 = arith.constant 0 : i32
    %c0_i32_0 = arith.constant 0 : i32
    %c0_i32_1 = arith.constant 0 : i32
    return %c0_i32, %c0_i32_0 : i32, i32
  }
  func.func @transform_6(%arg0: i32) -> (i32, i32) {
    %c0_i32 = arith.constant 0 : i32
    %c0_i32_0 = arith.constant 0 : i32
    %c0_i32_1 = arith.constant 0 : i32
    return %c0_i32, %c0_i32_0 : i32, i32
  }
  func.func @transform_7(%arg0: i32) -> (i32, i32) {
    %c0_i32 = arith.constant 0 : i32
    %c0_i32_0 = arith.constant 0 : i32
    return %arg0, %c0_i32 : i32, i32
  }
}

</mosaic_0001>

<bundles_post_ra>
// kernel: lower_network_forward.1
= control target key start
LH: loop header
LB: loop body
LE: loop exit
PB: predicated region body
PF: predicated region fallthrough
CT: control target
= control target key end

     0   :  { %v453_v0 = vmov 0.0   ;;  %vm454_vm0 = vmmov 0   ;;  %vm51_vm1 = vcmask 261120   ;;  %v321_v36 = vlaneseq  ;;  %s588_s1 = inlined_call_operand.vmem [shape: bf16[32,128], index: 1, kind: input, shape index: {}]   ;;  %s589_s3 = inlined_call_operand.vmem [shape: bf16[128,128], index: 3, kind: input, shape index: {}]   ;;  %s590_s0 = inlined_call_operand.vmem [shape: bf16[8,32], index: 0, kind: input, shape index: {}]   ;;  %s591_s5 = inlined_call_operand.vmem [shape: bf16[128,5], index: 5, kind: input, shape index: {}]   ;;  %s592_s2 = inlined_call_operand.vmem [shape: f32[1,128], index: 2, kind: input, shape index: {}]   ;;  %s593_s4 = inlined_call_operand.vmem [shape: f32[1,128], index: 4, kind: input, shape index: {}]   ;;  %s594_s6 = inlined_call_operand.vmem [shape: f32[1,5], index: 6, kind: input, shape index: {}]   ;;  %s595_s7 = inlined_call_operand.vmem [shape: f32[8,5], index: 7, kind: output, shape index: {}]  }
   0x1   :  { %379 = vmatprep.subr.bf16.mxu0 %v453_v0  ;;  %v429_v1 = vld [vmem:[%s588_s1] sm:$0xff]   ;;  %383 = vmatprep.mubr.msk.bf16.mxu0 %vm454_vm0, %v453_v0  ;;  %v430_v2 = vld [vmem:[%s588_s1 + $0x8] sm:$0xff]   ;;  %v433_v6 = vld [vmem:[%s589_s3 + $0x10] sm:$0xff]   ;;  %vm330_vm3 = vcmask 39936  }
   0x2   :  { %387 = vmatprep.subr.bf16.mxu1 %v453_v0  ;;  %403 = vmatprep.mubr.msk.bf16.mxu1 %vm454_vm0, %v453_v0  ;;  %v431_v3 = vld [vmem:[%s589_s3] sm:$0xff]   ;;  %v432_v4 = vld [vmem:[%s589_s3 + $0x8] sm:$0xff]   ;;  %v434_v7 = vld [vmem:[%s589_s3 + $0x18] sm:$0xff]   ;;  %v322_v38 = vand.u32 127, %v321_v36 }
   0x3   :  { %380 = vmatpush3.bf16.msra.mxu0 %v429_v1  ;;  %388 = vmatpush3.bf16.msra.mxu1 %v431_v3  ;;  %v27_v5 = vld [vmem:[%s590_s0] sm:$0xf]  ;;  %v436_v9 = vld [vmem:[%s589_s3 + $0x28] sm:$0xff]   ;;  %v437_v10 = vld [vmem:[%s589_s3 + $0x30] sm:$0xff]  }
   0x4   :  { %381 = vmatprep.subr.bf16.mxu0 %v453_v0  ;;  %389 = vmatprep.subr.bf16.mxu1 %v453_v0  ;;  %v435_v8 = vld [vmem:[%s589_s3 + $0x20] sm:$0xff]   ;;  %v438_v11 = vld [vmem:[%s589_s3 + $0x38] sm:$0xff]   ;;  %v440_v13 = vld [vmem:[%s591_s5 + $0x8] sm:$0xff]   ;;  %vm323_vm2 = vcmp.lt.s32.totalorder %v322_v38, 4 }
   0x5   :  { %v439_v12 = vld [vmem:[%s591_s5] sm:$0xff]   ;;  %v441_v14 = vld [vmem:[%s591_s5 + $0x10] sm:$0xff]   ;;  %v442_v15 = vld [vmem:[%s591_s5 + $0x18] sm:$0xff]  }
   0x6   :  { %v336_v16 = vld [vmem:[%s592_s2] ss:$0 sm:$0xff]  ;;  %v444_v25 = vld [vmem:[%s591_s5 + $0x28] sm:$0xff]   ;;  %v445_v26 = vld [vmem:[%s591_s5 + $0x30] sm:$0xff]  }
   0x7   :  { %382 = vmatpush3.bf16.msra.mxu0 %v430_v2  ;;  %390 = vmatpush3.bf16.msra.mxu1 %v432_v4  ;;  %v443_v24 = vld [vmem:[%s591_s5 + $0x20] sm:$0xff]   ;;  %v446_v27 = vld [vmem:[%s591_s5 + $0x38] sm:$0xff]  }
   0x8   :  { %407 = vmatprep.subr.bf16.mxu0 %v453_v0  ;;  %391 = vmatprep.subr.bf16.mxu1 %v453_v0  ;;  %v340_v28 = vld [vmem:[%s593_s4] ss:$0 sm:$0xff] }
   0x9   :  { %v349_v37 = vld [vmem:[%s594_s6] ss:$0 sm:$0xff] }
   0xa   :  { %384 = vmatmul.mubr.msk.bf16.vlgmr.msra.gmra.mrb[0].mxu0 %vm51_vm1, %v27_v5 }
   0xb   :  { %423 = vmatprep.mubr.msk.bf16.mxu0 %vm454_vm0, %v453_v0  ;;  %392 = vmatpush3.bf16.msra.mxu1 %v433_v6 }
   0xc   :  { %393 = vmatprep.subr.bf16.mxu1 %v453_v0  ;;  %408 = vmatpush3.bf16.msra.mxu0 %v439_v12 }
   0xd   :  { %409 = vmatprep.subr.bf16.mxu0 %v453_v0 }
   0xf   :  { %394 = vmatpush3.bf16.msra.mxu1 %v434_v7 }
  0x10   :  { %395 = vmatprep.subr.bf16.mxu1 %v453_v0  ;;  %410 = vmatpush3.bf16.msra.mxu0 %v440_v13 }
  0x11   :  { %411 = vmatprep.subr.bf16.mxu0 %v453_v0 }
  0x13   :  { %396 = vmatpush3.bf16.msra.mxu1 %v435_v8 }
  0x14   :  { %397 = vmatprep.subr.bf16.mxu1 %v453_v0  ;;  %412 = vmatpush3.bf16.msra.mxu0 %v441_v14 }
  0x15   :  { %413 = vmatprep.subr.bf16.mxu0 %v453_v0 }
  0x17   :  { %398 = vmatpush3.bf16.msra.mxu1 %v436_v9 }
  0x18   :  { %399 = vmatprep.subr.bf16.mxu1 %v453_v0  ;;  %414 = vmatpush3.bf16.msra.mxu0 %v442_v15 }
  0x19   :  { %415 = vmatprep.subr.bf16.mxu0 %v453_v0 }
  0x1b   :  { %400 = vmatpush3.bf16.msra.mxu1 %v437_v10 }
  0x1c   :  { %401 = vmatprep.subr.bf16.mxu1 %v453_v0  ;;  %416 = vmatpush3.bf16.msra.mxu0 %v443_v24 }
  0x1d   :  { %417 = vmatprep.subr.bf16.mxu0 %v453_v0 }
  0x1f   :  { %402 = vmatpush3.bf16.msra.mxu1 %v438_v11 }
  0x20   :  { %418 = vmatpush3.bf16.msra.mxu0 %v444_v25 }
  0x21   :  { %419 = vmatprep.subr.bf16.mxu0 %v453_v0 }
  0x24   :  { %420 = vmatpush3.bf16.msra.mxu0 %v445_v26 }
  0x25   :  { %421 = vmatprep.subr.bf16.mxu0 %v453_v0 }
  0x28   :  { %422 = vmatpush3.bf16.msra.mxu0 %v446_v27 }
  0xdd   :  { %v89_v17 = vpop.f32.mrb[0].mxu0 }
  0xde   :  { %v90_v18 = vadd.f32 %v336_v16, %v89_v17  ;;  %v385_v19 = vpop.f32.mrb[1].mxu0 }
  0xdf   :  { %v92_v20 = vpop.f32.mrb[2].mxu0 }
  0xe0   :  { %v95_v21 = vpack.c.bf16 %v90_v18, %v90_v18  ;;  %v386_v22 = vpop.f32.mrb[3].mxu0 }
  0xe2   :  { %447 = vtanh.bf16 %v95_v21 }
  0xed   :  { %v448_v23 = vpop.eup %447 }
  0xee   :  { %404 = vmatmul.mubr.bf16.vlgmr.msra.gmra.mrb[0].mxu1 %v448_v23 }
 0x1c1   :  { %v202_v29 = vpop.f32.mrb[0].mxu1 }
 0x1c2   :  { %v203_v30 = vadd.f32 %v340_v28, %v202_v29  ;;  %v405_v31 = vpop.f32.mrb[1].mxu1 }
 0x1c3   :  { %v205_v32 = vpop.f32.mrb[2].mxu1 }
 0x1c4   :  { %v208_v33 = vpack.c.bf16 %v203_v30, %v203_v30  ;;  %v406_v34 = vpop.f32.mrb[3].mxu1 }
 0x1c6   :  { %449 = vtanh.bf16 %v208_v33 }
 0x1d1   :  { %v450_v35 = vpop.eup %449 }
 0x1d2   :  { %424 = vmatmul.mubr.bf16.vlgmr.msra.gmra.mrb[4].mxu0 %v450_v35 }
 0x2a5   :  { %v315_v39 = vpop.f32.mrb[4].mxu0 }
 0x2a6   :  { %v316_v40 = vadd.f32 %v349_v37, %v315_v39  ;;  %v425_v41 = vpop.f32.mrb[5].mxu0 }
 0x2a7   :  { %v318_v42 = vpop.f32.mrb[6].mxu0 }
 0x2a8   :  { %v324_v43 = vmul.f32 0.5, %v316_v40  ;;  %v426_v44 = vpop.f32.mrb[7].mxu0 }
 0x2aa   :  { %v325_v45 = vsel %vm323_vm2, %v316_v40, %v324_v43 }
 0x2ab   :  { %451 = vtanh.f32 %v325_v45 }
 0x2b5   :  { %v452_v46 = vpop.eup %451 }
 0x2b6   :  { %v327_v47 = vadd.f32 1.0, %v452_v46 }
 0x2b8   :  { %v328_v48 = vmul.f32 0.5, %v327_v47 }
 0x2ba   :  { %v329_v49 = vsel %vm323_vm2, %v452_v46, %v328_v48 }
 0x2bb   :  { %331 = vst.msk [vmem:[%s595_s7] sm:$0xff] %vm330_vm3, %v329_v49 }

</bundles_post_ra>
